<compile_context>
chip_gen: v5e
topology: v5e:2x2
jax: 0.10.0
libtpu: 0.0.40
codegen_flags: <defaults>
</compile_context>

<pallas_src>
import functools

import jax
import jax.numpy as jnp
from jax.experimental import pallas as pl
from jax.experimental.pallas import tpu as pltpu

HIDDEN = 36     # fixed by the module: nn.Linear(input_num, 36)
LANE = 128
SUBLANE = 8


def _round_up(n, m):
    return (n + m - 1) // m * m


def mlp_kernel(x_ref, w1_ref, b1_ref, w2_ref, b2_ref, out_ref):
    # out = relu(x @ W1 + b1) @ W2 + b2, fully fused in VMEM.
    h = jnp.dot(x_ref[...], w1_ref[...], preferred_element_type=jnp.float32)
    h = jnp.maximum(h + b1_ref[...], 0.0)
    out_ref[...] = (
        jnp.dot(h, w2_ref[...], preferred_element_type=jnp.float32) + b2_ref[...]
    )


def prepare_params(params):
    """Once-per-param-set prep (hoisted out of the per-call path): pad weights
    and biases to lane-dense (multiple-of-128 last dim) f32 matrices."""
    w1, b1, w2, b2 = params              # w1: (F, 36), b1: (36,), w2: (36, C), b2: (C,)
    F, H = w1.shape
    C = w2.shape[1]
    Hp = _round_up(H, LANE)
    Cp = _round_up(C, LANE)
    w1p = jnp.zeros((F, Hp), jnp.float32).at[:, :H].set(w1.astype(jnp.float32))
    b1p = jnp.zeros((1, Hp), jnp.float32).at[:, :H].set(b1.astype(jnp.float32))
    w2p = jnp.zeros((Hp, Cp), jnp.float32).at[:H, :C].set(w2.astype(jnp.float32))
    b2p = jnp.zeros((1, Cp), jnp.float32).at[:, :C].set(b2.astype(jnp.float32))
    return w1p, b1p, w2p, b2p


@functools.partial(jax.jit, static_argnames=("num_classes", "block_b"))
def mlp_forward(x, padded_params, num_classes, block_b=512):
    """x: (..., input_num) f32  ->  (..., num_classes) f32 (matches the torch module)."""
    w1p, b1p, w2p, b2p = padded_params
    F = w1p.shape[0]
    Hp = w1p.shape[1]
    Cp = w2p.shape[1]

    # nn.Linear semantics: operate on the last dim, keep leading dims intact.
    lead_shape = x.shape[:-1]
    x2 = x.reshape(-1, F).astype(jnp.float32)
    B = x2.shape[0]

    # Batch tile: at least 8 (sublane-friendly), at most block_b; pad B up so
    # every grid step touches only valid (or zeroed) rows.
    TB = min(block_b, _round_up(B, SUBLANE))
    Bp = _round_up(B, TB)
    if Bp != B:
        x2 = jnp.zeros((Bp, F), jnp.float32).at[:B].set(x2)

    out = pl.pallas_call(
        mlp_kernel,
        out_shape=jax.ShapeDtypeStruct((Bp, Cp), jnp.float32),
        grid_spec=pltpu.PrefetchScalarGridSpec(
            num_scalar_prefetch=0,
            grid=(Bp // TB,),
            in_specs=[
                pl.BlockSpec((TB, F), lambda i: (i, 0)),    # streamed activations
                pl.BlockSpec((F, Hp), lambda i: (0, 0)),    # weights stay VMEM-resident
                pl.BlockSpec((1, Hp), lambda i: (0, 0)),
                pl.BlockSpec((Hp, Cp), lambda i: (0, 0)),
                pl.BlockSpec((1, Cp), lambda i: (0, 0)),
            ],
            out_specs=pl.BlockSpec((TB, Cp), lambda i: (i, 0)),  # lane-dense store
        ),
        compiler_params=pltpu.CompilerParams(
            dimension_semantics=("parallel",),
        ),
    )(x2, w1p, b1p, w2p, b2p)

    return out[:B, :num_classes].reshape(*lead_shape, num_classes)


def mlp_reference(x, params):
    """Pure-JAX reference mirroring the PyTorch forward."""
    w1, b1, w2, b2 = params
    return jnp.maximum(x @ w1 + b1, 0.0) @ w2 + b2


def init_params(key, input_num, num_classes):
    """Deterministic init matching nn.Linear(input_num, 36), nn.Linear(36, num_classes)
    (weights stored transposed so the kernel computes x @ W)."""
    k1, k2, k3, k4 = jax.random.split(key, 4)
    w1 = jax.random.uniform(k1, (input_num, HIDDEN), jnp.float32, -0.5, 0.5)
    b1 = jax.random.uniform(k2, (HIDDEN,), jnp.float32, -0.5, 0.5)
    w2 = jax.random.uniform(k3, (HIDDEN, num_classes), jnp.float32, -0.5, 0.5)
    b2 = jax.random.uniform(k4, (num_classes,), jnp.float32, -0.5, 0.5)
    return w1, b1, w2, b2


if __name__ == "__main__":
    B = 2
    input_num = 16
    num_classes = 10

    key = jax.random.PRNGKey(0)
    kx, kp = jax.random.split(key)
    x = jax.random.normal(kx, (B, input_num), jnp.float32)
    params = init_params(kp, input_num, num_classes)

    # Constant prep done once, outside the hot forward path.
    padded_params = jax.tree_util.tree_map(jax.device_put, prepare_params(params))

    out = mlp_forward(x, padded_params, num_classes=num_classes)
    out = jax.block_until_ready(out)

    ref = mlp_reference(x, params)
    assert out.shape == (B, num_classes)
    assert jnp.allclose(out, ref, atol=1e-5, rtol=1e-5), "mismatch vs reference"

    print("KERNEL_OK")
</pallas_src>

<mosaic_0001>
module attributes {stable_mosaic.version = 11 : i64} {
  func.func @mlp_kernel(%arg0: i32, %arg1: memref<8x16xf32, #tpu.memory_space<vmem>>, %arg2: memref<16x128xf32, #tpu.memory_space<vmem>>, %arg3: memref<1x128xf32, #tpu.memory_space<vmem>>, %arg4: memref<128x128xf32, #tpu.memory_space<vmem>>, %arg5: memref<1x128xf32, #tpu.memory_space<vmem>>, %arg6: memref<8x128xf32, #tpu.memory_space<vmem>>) attributes {dimension_semantics = [#tpu.dimension_semantics<parallel>], iteration_bounds = array<i64: 1>, scalar_prefetch = 0 : i64, scratch_operands = 0 : i64, tpu.core_type = #tpu.core_type<tc>, window_params = [{transform_indices = @transform_0, window_bounds = array<i64: 8, 16>}, {pipeline_mode = #tpu.pipeline_mode<synchronous>, transform_indices = @transform_1, window_bounds = array<i64: 16, 128>}, {pipeline_mode = #tpu.pipeline_mode<synchronous>, transform_indices = @transform_2, window_bounds = array<i64: 1, 128>}, {pipeline_mode = #tpu.pipeline_mode<synchronous>, transform_indices = @transform_3, window_bounds = array<i64: 128, 128>}, {pipeline_mode = #tpu.pipeline_mode<synchronous>, transform_indices = @transform_4, window_bounds = array<i64: 1, 128>}, {transform_indices = @transform_5, window_bounds = array<i64: 8, 128>}]} {
    %c0 = arith.constant 0 : index
    %c0_0 = arith.constant 0 : index
    %0 = vector.load %arg1[%c0, %c0_0] : memref<8x16xf32, #tpu.memory_space<vmem>>, vector<8x16xf32>
    %c0_1 = arith.constant 0 : index
    %c0_2 = arith.constant 0 : index
    %1 = vector.load %arg2[%c0_1, %c0_2] : memref<16x128xf32, #tpu.memory_space<vmem>>, vector<16x128xf32>
    %cst = arith.constant dense<0.000000e+00> : vector<8x128xf32>
    %2 = tpu.matmul %0, %1, %cst {dimension_numbers = #tpu.dot_dimension_numbers<[1], [0], [0], [1], [0, 0, 1, 1], [], []>} : vector<8x16xf32>, vector<16x128xf32>, vector<8x128xf32> -> vector<8x128xf32>
    %c0_3 = arith.constant 0 : index
    %c0_4 = arith.constant 0 : index
    %3 = vector.load %arg3[%c0_3, %c0_4] : memref<1x128xf32, #tpu.memory_space<vmem>>, vector<1x128xf32>
    %4 = vector.broadcast %3 : vector<1x128xf32> to vector<8x128xf32>
    %5 = arith.addf %2, %4 : vector<8x128xf32>
    %cst_5 = arith.constant 0.000000e+00 : f32
    %6 = vector.broadcast %cst_5 : f32 to vector<8x128xf32>
    %7 = arith.maximumf %5, %6 : vector<8x128xf32>
    %c0_6 = arith.constant 0 : index
    %c0_7 = arith.constant 0 : index
    %8 = vector.load %arg4[%c0_6, %c0_7] : memref<128x128xf32, #tpu.memory_space<vmem>>, vector<128x128xf32>
    %cst_8 = arith.constant dense<0.000000e+00> : vector<8x128xf32>
    %9 = tpu.matmul %7, %8, %cst_8 {dimension_numbers = #tpu.dot_dimension_numbers<[1], [0], [0], [1], [0, 0, 1, 1], [], []>} : vector<8x128xf32>, vector<128x128xf32>, vector<8x128xf32> -> vector<8x128xf32>
    %c0_9 = arith.constant 0 : index
    %c0_10 = arith.constant 0 : index
    %10 = vector.load %arg5[%c0_9, %c0_10] : memref<1x128xf32, #tpu.memory_space<vmem>>, vector<1x128xf32>
    %11 = vector.broadcast %10 : vector<1x128xf32> to vector<8x128xf32>
    %12 = arith.addf %9, %11 : vector<8x128xf32>
    %c0_11 = arith.constant 0 : index
    %c0_12 = arith.constant 0 : index
    %13 = vector.load %arg6[%c0_11, %c0_12] : memref<8x128xf32, #tpu.memory_space<vmem>>, vector<8x128xf32>
    tpu.vector_store %arg6[%c0_11, %c0_12], %12 {strides = array<i32>} : memref<8x128xf32, #tpu.memory_space<vmem>>, vector<8x128xf32>,
    return
  }
  func.func @transform_0(%arg0: i32) -> (i32, i32) {
    %c0_i32 = arith.constant 0 : i32
    %c0_i32_0 = arith.constant 0 : i32
    return %arg0, %c0_i32 : i32, i32
  }
  func.func @transform_1(%arg0: i32) -> (i32, i32) {
    %c0_i32 = arith.constant 0 : i32
    %c0_i32_0 = arith.constant 0 : i32
    %c0_i32_1 = arith.constant 0 : i32
    return %c0_i32, %c0_i32_0 : i32, i32
  }
  func.func @transform_2(%arg0: i32) -> (i32, i32) {
    %c0_i32 = arith.constant 0 : i32
    %c0_i32_0 = arith.constant 0 : i32
    %c0_i32_1 = arith.constant 0 : i32
    return %c0_i32, %c0_i32_0 : i32, i32
  }
  func.func @transform_3(%arg0: i32) -> (i32, i32) {
    %c0_i32 = arith.constant 0 : i32
    %c0_i32_0 = arith.constant 0 : i32
    %c0_i32_1 = arith.constant 0 : i32
    return %c0_i32, %c0_i32_0 : i32, i32
  }
  func.func @transform_4(%arg0: i32) -> (i32, i32) {
    %c0_i32 = arith.constant 0 : i32
    %c0_i32_0 = arith.constant 0 : i32
    %c0_i32_1 = arith.constant 0 : i32
    return %c0_i32, %c0_i32_0 : i32, i32
  }
  func.func @transform_5(%arg0: i32) -> (i32, i32) {
    %c0_i32 = arith.constant 0 : i32
    %c0_i32_0 = arith.constant 0 : i32
    return %arg0, %c0_i32 : i32, i32
  }
}

</mosaic_0001>

<bundles_post_ra>
// kernel: mlp_forward.1
= control target key start
LH: loop header
LB: loop body
LE: loop exit
PB: predicated region body
PF: predicated region fallthrough
CT: control target
= control target key end

     0   :  { %10 = vsyncpa [#allocation3], 0  ;;  %s242_s0 = inlined_call_operand.vmem [shape: f32[8,16], index: 0, kind: input, shape index: {}]   ;;  %s243_s1 = inlined_call_operand.hbm [shape: f32[16,128], index: 1, kind: input, shape index: {}]   ;;  %s244_s2 = inlined_call_operand.vmem [shape: f32[1,128], index: 2, kind: input, shape index: {}]   ;;  %s245_s3 = inlined_call_operand.hbm [shape: f32[128,128], index: 3, kind: input, shape index: {}]   ;;  %s246_s4 = inlined_call_operand.vmem [shape: f32[1,128], index: 4, kind: input, shape index: {}]   ;;  %s247_s5 = inlined_call_operand.vmem [shape: f32[8,128], index: 5, kind: output, shape index: {}]  }
   0x1   :  { %s18_s20 = sshll.u32 %s243_s1, 4  ;;  %s19_s20 = int_to_ptr.hbm [resolvable:$true] %s18_s20 }
   0x2   :  { %11 = vsyncpa [#allocation5], 0  ;;  %s190_s21 = smov [#allocation2]   ;;  %s33_s25 = sshll.u32 %s245_s3, 4  ;;  %s34_s25 = int_to_ptr.hbm [resolvable:$true] %s33_s25 }
   0x3   :  { %s20_s22 = sshll.u32 %s190_s21, 4  ;;  %s191_s26 = smov 128   ;;  %s21_s22 = int_to_ptr.vmem [resolvable:$true] %s20_s22 }
   0x4   :  { %s192_s27 = smov 8   ;;  %s193_s28 = smov [#allocation4]  }
   0x5   :  { %26 = dma.hbm_to_vmem [thread:$0]  %s19_s20, 256, %s21_s22, [#allocation3], %s191_s26, %s191_s26, %s192_s27  }
   0x6   :  { %s35_s29 = sshll.u32 %s193_s28, 4  ;;  %s36_s29 = int_to_ptr.vmem [resolvable:$true] %s35_s29 }
   0x7   :  { %41 = dma.hbm_to_vmem [thread:$0]  %s34_s25, 2048, %s36_s29, [#allocation5], %s191_s26, %s191_s26, %s192_s27  }
   0x8   :  { %186 = dma.done.wait [#allocation3], 256  }
   0x9   :  { %187 = vsyncadd [#allocation3], 4294967040 }
   0xa   :  { %188 = dma.done.wait [#allocation5], 2048  }
   0xb   :  { %189 = vsyncadd [#allocation5], 4294965248  ;;  %v54_v0 = vld [vmem:[#allocation2 + $0x8] sm:$0xff]  ;;  %v53_v1 = vld [vmem:[#allocation2] sm:$0xff]  ;;  %vm59_vm0 = vcmask 130048  }
   0xc   :  { %77 = vmatpush.msra.mxu0 %v54_v0  ;;  %v52_v2 = vld [vmem:[%s242_s0] sm:$0xff]  ;;  %v99_v3 = vld [vmem:[#allocation4 + $0x78] sm:$0xff]  ;;  %v97_v5 = vld [vmem:[#allocation4 + $0x68] sm:$0xff] }
   0xd   :  { %v98_v4 = vld [vmem:[#allocation4 + $0x70] sm:$0xff]  ;;  %104 = vmatpush.msra.mxu1 %v99_v3  ;;  %v96_v6 = vld [vmem:[#allocation4 + $0x60] sm:$0xff]  ;;  %v95_v7 = vld [vmem:[#allocation4 + $0x58] sm:$0xff] }
   0xe   :  { %78 = vmatpush.msra.mxu0 %v53_v1  ;;  %v94_v8 = vld [vmem:[#allocation4 + $0x50] sm:$0xff]  ;;  %v93_v9 = vld [vmem:[#allocation4 + $0x48] sm:$0xff]  ;;  %v92_v10 = vld [vmem:[#allocation4 + $0x40] sm:$0xff] }
   0xf   :  { %131 = vmatmul.msk.f32.vlgmr.msra.gmra.mxu0 %vm59_vm0, %v52_v2  ;;  %105 = vmatpush.msra.mxu1 %v98_v4  ;;  %v91_v11 = vld [vmem:[#allocation4 + $0x38] sm:$0xff]  ;;  %v90_v12 = vld [vmem:[#allocation4 + $0x30] sm:$0xff]  ;;  %v89_v13 = vld [vmem:[#allocation4 + $0x28] sm:$0xff] }
  0x10   :  { %v88_v14 = vld [vmem:[#allocation4 + $0x20] sm:$0xff]  ;;  %v87_v15 = vld [vmem:[#allocation4 + $0x18] sm:$0xff]  ;;  %v86_v16 = vld [vmem:[#allocation4 + $0x10] sm:$0xff] }
  0x11   :  { %106 = vmatpush.msra.mxu1 %v97_v5  ;;  %v85_v17 = vld [vmem:[#allocation4 + $0x8] sm:$0xff]  ;;  %v84_v18 = vld [vmem:[#allocation4] sm:$0xff]  ;;  %v136_v19 = vld [vmem:[%s244_s2] ss:$0 sm:$0xff] }
  0x12   :  { %v137_v23 = vld [vmem:[%s246_s4] ss:$0 sm:$0xff] }
  0x13   :  { %107 = vmatpush.msra.mxu1 %v96_v6 }
  0x15   :  { %108 = vmatpush.msra.mxu1 %v95_v7 }
  0x17   :  { %109 = vmatpush.msra.mxu1 %v94_v8 }
  0x19   :  { %110 = vmatpush.msra.mxu1 %v93_v9 }
  0x1b   :  { %111 = vmatpush.msra.mxu1 %v92_v10 }
  0x1d   :  { %112 = vmatpush.msra.mxu1 %v91_v11 }
  0x1f   :  { %113 = vmatpush.msra.mxu1 %v90_v12 }
  0x21   :  { %114 = vmatpush.msra.mxu1 %v89_v13 }
  0x23   :  { %115 = vmatpush.msra.mxu1 %v88_v14 }
  0x25   :  { %116 = vmatpush.msra.mxu1 %v87_v15 }
  0x27   :  { %117 = vmatpush.msra.mxu1 %v86_v16 }
  0x29   :  { %118 = vmatpush.msra.mxu1 %v85_v17 }
  0x2b   :  { %119 = vmatpush.msra.mxu1 %v84_v18 }
  0x8c   :  { %v80_v20 = vpop.f32.mrf.mxu0 }
  0x8d   :  { %v81_v21 = vadd.f32 %v136_v19, %v80_v20 }
  0x8f   :  { %v83_v22 = vmax.f32 %v81_v21, 0.0 }
  0x91   :  { %120 = vmatmul.f32.vlgmr.msra.gmra.mxu1 %v83_v22 }
 0x10e   :  { %v121_v24 = vpop.f32.mrf.mxu1 }
 0x10f   :  { %v122_v25 = vadd.f32 %v137_v23, %v121_v24 }
 0x111   :  { %124 = vst [vmem:[%s247_s5] sm:$0xff] %v122_v25 }
 0x112   :  { %129 = vsyncpa [#allocation3], 1 }
 0x113   :  { %130 = vsyncpa [#allocation5], 1 }

</bundles_post_ra>
